<compile_context>
chip_gen: v7x
topology: tpu7x:2x2x1
jax: 0.10.0
libtpu: 0.0.40
codegen_flags: <defaults>
</compile_context>

<pallas_src>
import functools

import jax
import jax.numpy as jnp
from jax.experimental import pallas as pl
from jax.experimental.pallas import tpu as pltpu

_BN_EPS = 1e-5
_LANE = 128
_SUBLANE = 8


def _round_up(x, m):
    return (x + m - 1) // m * m


def _deepfm_kernel(n_layers, *refs):
    # ref order:
    #   concat (TB, FD), first_row (1, TB) f32, selector (FD, Dp),
    #   [W_i (Kp_i, Np_i), b_i (1, Np_i) f32] * n_layers,
    #   wl_row (1, Np_last), out (1, TB) f32
    concat_ref, first_ref, sel_ref = refs[:3]
    layer_refs = refs[3:3 + 2 * n_layers]
    wl_ref = refs[3 + 2 * n_layers]
    out_ref = refs[-1]

    concat = concat_ref[...]                                 # (TB, FD) compute dt
    concat_f32 = concat.astype(jnp.float32)

    # ---- FM second-order term (selector matmul + one lane reduce) ----
    sum_sq = jnp.sum(concat_f32 * concat_f32, axis=1)        # (TB,)
    sum_f = jnp.dot(concat, sel_ref[...],
                    preferred_element_type=jnp.float32)      # (TB, Dp)
    fm_second = 0.5 * (jnp.sum(sum_f * sum_f, axis=1) - sum_sq)

    # ---- deep MLP (BN folded into W/b; Dropout = identity, eval mode) ----
    h = concat
    for i in range(n_layers):
        w_ref, b_ref = layer_refs[2 * i], layer_refs[2 * i + 1]
        z = jnp.dot(h, w_ref[...], preferred_element_type=jnp.float32)
        z = z + b_ref[...]
        h = jnp.maximum(z, 0.0).astype(concat.dtype)         # ReLU

    # final single-column layer: VPU multiply + lane reduce (its bias is
    # folded into first_row on the host side).
    mlp_out = jnp.sum(h.astype(jnp.float32) * wl_ref[...].astype(jnp.float32),
                      axis=1)                                # (TB,)

    logits = first_ref[0, :] + fm_second + mlp_out           # (TB,)
    out_ref[...] = jax.nn.sigmoid(logits)[None, :]           # (1, TB) lane-dense


def deepfm_forward(x, params, field_dims, fact_num, mlp_dims,
                   compute_dtype=jnp.bfloat16):
    B, F = x.shape
    D = fact_num
    FD = F * D
    n_layers = len(mlp_dims)
    itemsize = jnp.dtype(compute_dtype).itemsize

    # ---- glue (XLA): embedding gathers + first-order affine term ----
    # TODO(synk): fuse the embedding gather into the kernel via
    # PrefetchScalarGridSpec + pl.Element row indexing to avoid one HBM round
    # trip on the (B, F*D) activations.
    concat = params["embedding"][x].reshape(B, FD).astype(compute_dtype)
    fc_sum = jnp.sum(params["fc"][x][..., 0], axis=1)                    # (B,)
    first_row = (fc_sum * params["lin_w"][0, 0] + params["lin_b"][0, 0]
                 + params["b_last"][0, 0]).astype(jnp.float32)[None, :]  # (1, B)

    # ---- fold BatchNorm (eval stats mean=0, var=1) into W/b and zero-pad
    # hidden dims to lane multiples ----
    bn_denom = jnp.sqrt(jnp.float32(1.0 + _BN_EPS))
    weights, biases = [], []
    in_dim, in_pad = FD, FD
    for i in range(n_layers):
        dim = mlp_dims[i]
        out_pad = _round_up(dim, _LANE)
        scale = params[f"g{i}"] / bn_denom                               # (1, dim)
        w = params[f"W{i}"] * scale
        b = params[f"b{i}"] * scale + params[f"beta{i}"]
        w = jnp.pad(w, ((0, in_pad - in_dim), (0, out_pad - dim)))
        b = jnp.pad(b, ((0, 0), (0, out_pad - dim)))
        weights.append(w.astype(compute_dtype))
        biases.append(b.astype(jnp.float32))
        in_dim, in_pad = dim, out_pad
    wl_row = jnp.pad(params["W_last"].T, ((0, 0), (0, in_pad - in_dim)))
    wl_row = wl_row.astype(compute_dtype)                                # (1, Np_last)

    # constant 0/1 field-sum selector: (concat @ S)[b, d] = sum_f concat[b, f*D+d]
    D_pad = _round_up(D, _LANE)
    sel = jnp.tile(jnp.eye(D, dtype=compute_dtype), (F, 1))              # (FD, D)
    sel = jnp.pad(sel, ((0, 0), (0, D_pad - D)))                         # (FD, Dp)

    # ---- batch-tile selection under an explicit VMEM budget ----
    try:
        vmem_cap = int(pltpu.get_tpu_info().vmem_capacity_bytes)
    except Exception:
        vmem_cap = 64 * 1024 * 1024                                      # v7x floor
    budget = vmem_cap // 2                                               # headroom

    def _tile_bytes(shape, isz):
        # conservative sublane (16) / lane (128) padded footprint
        return _round_up(shape[0], 2 * _SUBLANE) * _round_up(shape[1], _LANE) * isz

    fixed = 2 * _tile_bytes(sel.shape, itemsize)                         # dbl-buffered
    for w, b in zip(weights, biases):
        fixed += 2 * _tile_bytes(w.shape, itemsize)
        fixed += 2 * _tile_bytes(b.shape, 4)
    fixed += 2 * _tile_bytes(wl_row.shape, itemsize)
    per_row = 2 * _round_up(FD, _LANE) * itemsize                        # concat tile
    per_row += 2 * 2 * _SUBLANE * 4                                      # first_row + out

    TB = None
    for cand in (2048, 1024, 512, 256, 128):
        if B >= 2 * cand and fixed + cand * per_row <= budget:
            TB = cand                                                    # grid >= 2 steps
            break
    if TB is None:
        TB = 128 if B > 256 else B                                       # no full-batch tile
    B_pad = _round_up(B, TB)
    if B_pad != B:
        concat = jnp.pad(concat, ((0, B_pad - B), (0, 0)))
        first_row = jnp.pad(first_row, ((0, 0), (0, B_pad - B)))
    grid = (B_pad // TB,)

    in_specs = [
        pl.BlockSpec((TB, FD), lambda i: (i, 0)),        # concat: batch tiled
        pl.BlockSpec((1, TB), lambda i: (0, i)),         # first-order row: lane tiled
        pl.BlockSpec(sel.shape, lambda i: (0, 0)),       # resident selector
    ]
    inputs = [concat, first_row, sel]
    for w, b in zip(weights, biases):
        in_specs.append(pl.BlockSpec(w.shape, lambda i: (0, 0)))   # resident weights
        in_specs.append(pl.BlockSpec(b.shape, lambda i: (0, 0)))   # resident bias
        inputs.extend([w, b])
    in_specs.append(pl.BlockSpec(wl_row.shape, lambda i: (0, 0)))
    inputs.append(wl_row)

    matmul_flops = FD * D_pad
    k = FD
    for w in weights:
        matmul_flops += k * w.shape[1]
        k = w.shape[1]
    matmul_flops += k
    cost = pl.CostEstimate(
        flops=int(2 * B_pad * matmul_flops),
        transcendentals=int(B_pad),
        bytes_accessed=int(concat.nbytes + first_row.nbytes + sel.nbytes
                           + sum(w.nbytes for w in weights)
                           + sum(b.nbytes for b in biases)
                           + wl_row.nbytes + 4 * B_pad),
    )

    est = fixed + TB * per_row
    vmem_limit = int(min(int(vmem_cap * 0.9), max(32 * 1024 * 1024, 2 * est)))

    kernel = functools.partial(_deepfm_kernel, n_layers)
    out = pl.pallas_call(
        kernel,
        out_shape=jax.ShapeDtypeStruct((1, B_pad), jnp.float32),
        grid=grid,
        in_specs=in_specs,
        out_specs=pl.BlockSpec((1, TB), lambda i: (0, i)),
        compiler_params=pltpu.CompilerParams(
            dimension_semantics=("parallel",),
            vmem_limit_bytes=vmem_limit),
        cost_estimate=cost,
    )(*inputs)
    return out[0, :B]                                    # (B,) == squeeze(dim=1)


def init_params(key, field_dims, fact_num, mlp_dims):
    num_inputs = int(sum(field_dims))
    F = len(field_dims)

    def xavier(k, shape):
        fan_in, fan_out = shape[0], shape[1]
        std = (2.0 / (fan_in + fan_out)) ** 0.5
        return (std * jax.random.normal(k, shape)).astype(jnp.float32)

    keys = iter(jax.random.split(key, 4 + 2 * (len(mlp_dims) + 1)))
    params = {
        "embedding": xavier(next(keys), (num_inputs, fact_num)),
        "fc": xavier(next(keys), (num_inputs, 1)),
        "lin_w": xavier(next(keys), (1, 1)),
        "lin_b": jnp.zeros((1, 1), jnp.float32),
    }
    in_dim = F * fact_num
    for i, dim in enumerate(mlp_dims):
        params[f"W{i}"] = xavier(next(keys), (in_dim, dim))
        params[f"b{i}"] = 0.01 * jnp.ones((1, dim), jnp.float32)
        params[f"g{i}"] = jnp.ones((1, dim), jnp.float32)      # BN gamma
        params[f"beta{i}"] = jnp.zeros((1, dim), jnp.float32)  # BN beta
        in_dim = dim
    params["W_last"] = xavier(next(keys), (in_dim, 1))
    params["b_last"] = jnp.zeros((1, 1), jnp.float32)
    return params


def deepfm_reference(x, params, field_dims, fact_num, mlp_dims):
    # Pure-JAX reference (eval mode, unfolded BN) for correctness checking.
    B, F = x.shape
    D = fact_num
    emb = params["embedding"][x]
    square_sum = jnp.sum(emb, axis=1) ** 2
    sum_square = jnp.sum(emb ** 2, axis=1)
    fm_second = 0.5 * jnp.sum(square_sum - sum_square, axis=1, keepdims=True)
    fc_sum = jnp.sum(params["fc"][x][..., 0], axis=1, keepdims=True)
    fm_first = fc_sum * params["lin_w"][0, 0] + params["lin_b"][0, 0]
    h = emb.reshape(B, F * D)
    for i in range(len(mlp_dims)):
        z = h @ params[f"W{i}"] + params[f"b{i}"]
        z = z / jnp.sqrt(1.0 + _BN_EPS) * params[f"g{i}"] + params[f"beta{i}"]
        h = jnp.maximum(z, 0.0)
    mlp_out = h @ params["W_last"] + params["b_last"]
    return jax.nn.sigmoid(fm_first + fm_second + mlp_out)[:, 0]


if __name__ == "__main__":
    def run_case(field_dims, fact_num, mlp_dims, B, compute_dtype, atol, rtol):
        key = jax.random.PRNGKey(0)
        kp, kx = jax.random.split(key)
        params = init_params(kp, field_dims, fact_num, mlp_dims)
        num_inputs = int(sum(field_dims))
        x = jax.random.randint(kx, (B, len(field_dims)), 0, num_inputs,
                               dtype=jnp.int32)
        out = deepfm_forward(x, params, field_dims, fact_num, mlp_dims,
                             compute_dtype=compute_dtype)
        out = jax.block_until_ready(out)
        ref = deepfm_reference(x, params, field_dims, fact_num, mlp_dims)
        assert out.shape == (B,)
        err = float(jnp.max(jnp.abs(out - ref)))
        assert jnp.allclose(out, ref, atol=atol, rtol=rtol), err

    # Small shapes, f32, single-tile path (tight tolerance vs. reference).
    run_case([3, 4, 5], 8, (32, 16), 8, jnp.float32, 2e-5, 2e-5)
    # bf16 production config: tiled multi-step grid (TB=256, grid=4) with
    # ragged-batch zero padding (B=1000 -> 1024).
    run_case([30] * 16, 16, (64, 32), 1000, jnp.bfloat16, 2e-2, 2e-2)
    print("KERNEL_OK")
</pallas_src>

<mosaic_0001>
module attributes {stable_mosaic.version = 11 : i64} {
  func.func @_deepfm_kernel(%arg0: i32, %arg1: memref<8x24xf32, #tpu.memory_space<vmem>>, %arg2: memref<1x8xf32, #tpu.memory_space<vmem>>, %arg3: memref<24x128xf32, #tpu.memory_space<vmem>>, %arg4: memref<24x128xf32, #tpu.memory_space<vmem>>, %arg5: memref<1x128xf32, #tpu.memory_space<vmem>>, %arg6: memref<128x128xf32, #tpu.memory_space<vmem>>, %arg7: memref<1x128xf32, #tpu.memory_space<vmem>>, %arg8: memref<1x128xf32, #tpu.memory_space<vmem>>, %arg9: memref<1x8xf32, #tpu.memory_space<vmem>>) attributes {dimension_semantics = [#tpu.dimension_semantics<parallel>], iteration_bounds = array<i64: 1>, scalar_prefetch = 0 : i64, scratch_operands = 0 : i64, tpu.core_type = #tpu.core_type<tc>, window_params = [{transform_indices = @transform_0, window_bounds = array<i64: 8, 24>}, {transform_indices = @transform_1, window_bounds = array<i64: 1, 8>}, {pipeline_mode = #tpu.pipeline_mode<synchronous>, transform_indices = @transform_2, window_bounds = array<i64: 24, 128>}, {pipeline_mode = #tpu.pipeline_mode<synchronous>, transform_indices = @transform_3, window_bounds = array<i64: 24, 128>}, {pipeline_mode = #tpu.pipeline_mode<synchronous>, transform_indices = @transform_4, window_bounds = array<i64: 1, 128>}, {pipeline_mode = #tpu.pipeline_mode<synchronous>, transform_indices = @transform_5, window_bounds = array<i64: 128, 128>}, {pipeline_mode = #tpu.pipeline_mode<synchronous>, transform_indices = @transform_6, window_bounds = array<i64: 1, 128>}, {pipeline_mode = #tpu.pipeline_mode<synchronous>, transform_indices = @transform_7, window_bounds = array<i64: 1, 128>}, {transform_indices = @transform_8, window_bounds = array<i64: 1, 8>}]} {
    %c0 = arith.constant 0 : index
    %c0_0 = arith.constant 0 : index
    %0 = vector.load %arg1[%c0, %c0_0] : memref<8x24xf32, #tpu.memory_space<vmem>>, vector<8x24xf32>
    %1 = arith.mulf %0, %0 : vector<8x24xf32>
    %cst = arith.constant dense<0.000000e+00> : vector<8xf32>
    %2 = vector.multi_reduction <add>, %1, %cst [1] : vector<8x24xf32> to vector<8xf32>
    %c0_1 = arith.constant 0 : index
    %c0_2 = arith.constant 0 : index
    %3 = vector.load %arg3[%c0_1, %c0_2] : memref<24x128xf32, #tpu.memory_space<vmem>>, vector<24x128xf32>
    %cst_3 = arith.constant dense<0.000000e+00> : vector<8x128xf32>
    %4 = tpu.matmul %0, %3, %cst_3 {dimension_numbers = #tpu.dot_dimension_numbers<[1], [0], [0], [1], [0, 0, 1, 1], [], []>} : vector<8x24xf32>, vector<24x128xf32>, vector<8x128xf32> -> vector<8x128xf32>
    %5 = arith.mulf %4, %4 : vector<8x128xf32>
    %cst_4 = arith.constant dense<0.000000e+00> : vector<8xf32>
    %6 = vector.multi_reduction <add>, %5, %cst_4 [1] : vector<8x128xf32> to vector<8xf32>
    %7 = arith.subf %6, %2 : vector<8xf32>
    %cst_5 = arith.constant 5.000000e-01 : f32
    %8 = vector.broadcast %cst_5 : f32 to vector<8xf32>
    %9 = arith.mulf %8, %7 : vector<8xf32>
    %c0_6 = arith.constant 0 : index
    %c0_7 = arith.constant 0 : index
    %10 = vector.load %arg4[%c0_6, %c0_7] : memref<24x128xf32, #tpu.memory_space<vmem>>, vector<24x128xf32>
    %cst_8 = arith.constant dense<0.000000e+00> : vector<8x128xf32>
    %11 = tpu.matmul %0, %10, %cst_8 {dimension_numbers = #tpu.dot_dimension_numbers<[1], [0], [0], [1], [0, 0, 1, 1], [], []>} : vector<8x24xf32>, vector<24x128xf32>, vector<8x128xf32> -> vector<8x128xf32>
    %c0_9 = arith.constant 0 : index
    %c0_10 = arith.constant 0 : index
    %12 = vector.load %arg5[%c0_9, %c0_10] : memref<1x128xf32, #tpu.memory_space<vmem>>, vector<1x128xf32>
    %13 = vector.broadcast %12 : vector<1x128xf32> to vector<8x128xf32>
    %14 = arith.addf %11, %13 : vector<8x128xf32>
    %cst_11 = arith.constant 0.000000e+00 : f32
    %15 = vector.broadcast %cst_11 : f32 to vector<8x128xf32>
    %16 = arith.maximumf %14, %15 : vector<8x128xf32>
    %c0_12 = arith.constant 0 : index
    %c0_13 = arith.constant 0 : index
    %17 = vector.load %arg6[%c0_12, %c0_13] : memref<128x128xf32, #tpu.memory_space<vmem>>, vector<128x128xf32>
    %cst_14 = arith.constant dense<0.000000e+00> : vector<8x128xf32>
    %18 = tpu.matmul %16, %17, %cst_14 {dimension_numbers = #tpu.dot_dimension_numbers<[1], [0], [0], [1], [0, 0, 1, 1], [], []>} : vector<8x128xf32>, vector<128x128xf32>, vector<8x128xf32> -> vector<8x128xf32>
    %c0_15 = arith.constant 0 : index
    %c0_16 = arith.constant 0 : index
    %19 = vector.load %arg7[%c0_15, %c0_16] : memref<1x128xf32, #tpu.memory_space<vmem>>, vector<1x128xf32>
    %20 = vector.broadcast %19 : vector<1x128xf32> to vector<8x128xf32>
    %21 = arith.addf %18, %20 : vector<8x128xf32>
    %cst_17 = arith.constant 0.000000e+00 : f32
    %22 = vector.broadcast %cst_17 : f32 to vector<8x128xf32>
    %23 = arith.maximumf %21, %22 : vector<8x128xf32>
    %c0_18 = arith.constant 0 : index
    %c0_19 = arith.constant 0 : index
    %24 = vector.load %arg8[%c0_18, %c0_19] : memref<1x128xf32, #tpu.memory_space<vmem>>, vector<1x128xf32>
    %25 = vector.broadcast %24 : vector<1x128xf32> to vector<8x128xf32>
    %26 = arith.mulf %23, %25 : vector<8x128xf32>
    %cst_20 = arith.constant dense<0.000000e+00> : vector<8xf32>
    %27 = vector.multi_reduction <add>, %26, %cst_20 [1] : vector<8x128xf32> to vector<8xf32>
    %c0_21 = arith.constant 0 : index
    %c0_22 = arith.constant 0 : index
    %28 = vector.load %arg2[%c0_21, %c0_22] : memref<1x8xf32, #tpu.memory_space<vmem>>, vector<1x8xf32>
    %29 = vector.shape_cast %28 : vector<1x8xf32> to vector<8xf32>
    %30 = arith.addf %29, %9 : vector<8xf32>
    %31 = arith.addf %30, %27 : vector<8xf32>
    %32 = arith.negf %31 : vector<8xf32>
    %33 = math.exp %32 : vector<8xf32>
    %cst_23 = arith.constant 1.000000e+00 : f32
    %34 = vector.broadcast %cst_23 : f32 to vector<8xf32>
    %35 = arith.addf %34, %33 : vector<8xf32>
    %36 = arith.divf %34, %35 : vector<8xf32>
    %37 = vector.shape_cast %36 : vector<8xf32> to vector<1x8xf32>
    %c0_24 = arith.constant 0 : index
    %c0_25 = arith.constant 0 : index
    %38 = vector.load %arg9[%c0_24, %c0_25] : memref<1x8xf32, #tpu.memory_space<vmem>>, vector<1x8xf32>
    tpu.vector_store %arg9[%c0_24, %c0_25], %37 {strides = array<i32>} : memref<1x8xf32, #tpu.memory_space<vmem>>, vector<1x8xf32>,
    return
  }
  func.func @transform_0(%arg0: i32) -> (i32, i32) {
    %c0_i32 = arith.constant 0 : i32
    %c0_i32_0 = arith.constant 0 : i32
    return %arg0, %c0_i32 : i32, i32
  }
  func.func @transform_1(%arg0: i32) -> (i32, i32) {
    %c0_i32 = arith.constant 0 : i32
    %c0_i32_0 = arith.constant 0 : i32
    return %c0_i32, %arg0 : i32, i32
  }
  func.func @transform_2(%arg0: i32) -> (i32, i32) {
    %c0_i32 = arith.constant 0 : i32
    %c0_i32_0 = arith.constant 0 : i32
    %c0_i32_1 = arith.constant 0 : i32
    return %c0_i32, %c0_i32_0 : i32, i32
  }
  func.func @transform_3(%arg0: i32) -> (i32, i32) {
    %c0_i32 = arith.constant 0 : i32
    %c0_i32_0 = arith.constant 0 : i32
    %c0_i32_1 = arith.constant 0 : i32
    return %c0_i32, %c0_i32_0 : i32, i32
  }
  func.func @transform_4(%arg0: i32) -> (i32, i32) {
    %c0_i32 = arith.constant 0 : i32
    %c0_i32_0 = arith.constant 0 : i32
    %c0_i32_1 = arith.constant 0 : i32
    return %c0_i32, %c0_i32_0 : i32, i32
  }
  func.func @transform_5(%arg0: i32) -> (i32, i32) {
    %c0_i32 = arith.constant 0 : i32
    %c0_i32_0 = arith.constant 0 : i32
    %c0_i32_1 = arith.constant 0 : i32
    return %c0_i32, %c0_i32_0 : i32, i32
  }
  func.func @transform_6(%arg0: i32) -> (i32, i32) {
    %c0_i32 = arith.constant 0 : i32
    %c0_i32_0 = arith.constant 0 : i32
    %c0_i32_1 = arith.constant 0 : i32
    return %c0_i32, %c0_i32_0 : i32, i32
  }
  func.func @transform_7(%arg0: i32) -> (i32, i32) {
    %c0_i32 = arith.constant 0 : i32
    %c0_i32_0 = arith.constant 0 : i32
    %c0_i32_1 = arith.constant 0 : i32
    return %c0_i32, %c0_i32_0 : i32, i32
  }
  func.func @transform_8(%arg0: i32) -> (i32, i32) {
    %c0_i32 = arith.constant 0 : i32
    %c0_i32_0 = arith.constant 0 : i32
    return %c0_i32, %arg0 : i32, i32
  }
}

</mosaic_0001>

<bundles_post_ra>
// kernel: tpu_custom_call.1
= control target key start
LH: loop header
LB: loop body
LE: loop exit
PB: predicated region body
PF: predicated region fallthrough
CT: control target
= control target key end

     0   :  { %13 = vsyncpa [#allocation3], 0  ;;  %s1011_s0 = inlined_call_operand.hbm [shape: f32[8,24], index: 0, kind: input, shape index: {}]   ;;  %s1012_s1 = inlined_call_operand.vmem [shape: f32[1,8], index: 1, kind: input, shape index: {}]   ;;  %s1013_s2 = inlined_call_operand.hbm [shape: f32[24,128], index: 2, kind: input, shape index: {}]   ;;  %s1014_s3 = inlined_call_operand.hbm [shape: f32[24,128], index: 3, kind: input, shape index: {}]   ;;  %s1015_s4 = inlined_call_operand.vmem [shape: f32[1,128], index: 4, kind: input, shape index: {}]   ;;  %s1016_s5 = inlined_call_operand.hbm [shape: f32[128,128], index: 5, kind: input, shape index: {}]   ;;  %s1017_s6 = inlined_call_operand.vmem [shape: f32[1,128], index: 6, kind: input, shape index: {}]   ;;  %s1018_s7 = inlined_call_operand.vmem [shape: f32[1,128], index: 7, kind: input, shape index: {}]   ;;  %s1019_s8 = inlined_call_operand.hbm [shape: f32[1,8], index: 8, kind: output, shape index: {}]  }
   0x1   :  { %14 = vsyncpa [#allocation6], 0 }
   0x2   :  { %15 = vsyncpa [#allocation9], 0 }
   0x3   :  { %16 = vsyncpa [#allocation4], 0  ;;  %s843_s27 = smov [#allocation5]   ;;  %s725_s9 = scalar_lea.hbm %s1013_s2, 384 }
   0x4   :  { %s34_s28 = sshll.u32 %s843_s27, 4  ;;  %p726_p0 = scmp.ne.s32.totalorder %s1013_s2, %s725_s9  ;;  %s35_s28 = int_to_ptr.vmem [resolvable:$true] %s34_s28 }
   0x5   :  { %p729_p1 = scmp.lt.u32.totalorder %s725_s9, %s1013_s2 }
   0x7   :  { %p731_p2 = pnand %p729_p1, %p726_p0 }
   0x9   :  { %734 = shalt.err (!%p731_p2)
}
   0xa   :  { %s735_s14 = scalar_lea.vmem %s35_s28, 384  ;;  %p740_p4 = scmp.lt.s32.totalorder %s35_s28, %s35_s28 }
   0xb   :  { %p736_p3 = scmp.ne.s32.totalorder %s35_s28, %s735_s14  ;;  %p741_p5 = scmp.lt.s32.totalorder %s735_s14, %s735_s14 }
   0xd   :  { %p742_p6 = por %p741_p5, %p740_p4 }
   0xf   :  { %p743_p7 = pnand %p742_p6, %p736_p3 }
  0x11   :  { %746 = shalt.err (!%p743_p7)
}
  0x12   :  { %s844_s15 = smov 128   ;;  %s845_s16 = smov 8  }
  0x13   :  { %40 = dma.hbm_to_vmem [thread:$0]  %s1013_s2, 384, %s35_s28, [#allocation6], %s844_s15, %s844_s15, %s845_s16  }
  0x14   :  { %s846_s19 = smov [#allocation2]   ;;  %s847_s21 = smov [#allocation7]  }
  0x15   :  { %s23_s20 = sshll.u32 %s846_s19, 4  ;;  %s46_s22 = sshll.u32 %s847_s21, 4  ;;  %s24_s20 = int_to_ptr.vmem [resolvable:$true] %s23_s20  ;;  %s47_s22 = int_to_ptr.vmem [resolvable:$true] %s46_s22 }
  0x16   :  { %s747_s25 = scalar_lea.hbm %s1011_s0, 128 }
  0x17   :  { %p748_p8 = scmp.ne.s32.totalorder %s1011_s0, %s747_s25  ;;  %p751_p9 = scmp.lt.u32.totalorder %s747_s25, %s1011_s0 }
  0x19   :  { %p753_p10 = pnand %p751_p9, %p748_p8 }
  0x1b   :  { %756 = shalt.err (!%p753_p10)
}
  0x1c   :  { %s757_s2 = scalar_lea.vmem %s24_s20, 128  ;;  %p762_p12 = scmp.lt.s32.totalorder %s24_s20, %s24_s20 }
  0x1d   :  { %p758_p11 = scmp.ne.s32.totalorder %s24_s20, %s757_s2  ;;  %p763_p13 = scmp.lt.s32.totalorder %s757_s2, %s757_s2 }
  0x1f   :  { %p764_p0 = por %p763_p13, %p762_p12 }
  0x21   :  { %p765_p1 = pnand %p764_p0, %p758_p11 }
  0x23   :  { %768 = shalt.err (!%p765_p1)
}
  0x24   :  { %26 = dma.hbm_to_vmem [thread:$0]  %s1011_s0, 128, %s24_s20, [#allocation3]  }
  0x25   :  { %s769_s12 = scalar_lea.hbm %s1014_s3, 384 }
  0x26   :  { %p770_p2 = scmp.ne.s32.totalorder %s1014_s3, %s769_s12  ;;  %p773_p3 = scmp.lt.u32.totalorder %s769_s12, %s1014_s3 }
  0x28   :  { %p775_p4 = pnand %p773_p3, %p770_p2 }
  0x2a   :  { %778 = shalt.err (!%p775_p4)
}
  0x2b   :  { %s779_s19 = scalar_lea.vmem %s47_s22, 384  ;;  %p784_p6 = scmp.lt.s32.totalorder %s47_s22, %s47_s22 }
  0x2c   :  { %p780_p5 = scmp.ne.s32.totalorder %s47_s22, %s779_s19  ;;  %p785_p7 = scmp.lt.s32.totalorder %s779_s19, %s779_s19 }
  0x2e   :  { %p786_p8 = por %p785_p7, %p784_p6 }
  0x30   :  { %p787_p9 = pnand %p786_p8, %p780_p5 }
  0x32   :  { %790 = shalt.err (!%p787_p9)
}
  0x33   :  { %52 = dma.hbm_to_vmem [thread:$0]  %s1014_s3, 384, %s47_s22, [#allocation6], %s844_s15, %s844_s15, %s845_s16  }
  0x34   :  { %s848_s21 = smov [#allocation8]   ;;  %s791_s26 = scalar_lea.hbm %s1016_s5, 2048 }
  0x35   :  { %s60_s23 = sshll.u32 %s848_s21, 4  ;;  %p792_p10 = scmp.ne.s32.totalorder %s1016_s5, %s791_s26  ;;  %s61_s23 = int_to_ptr.vmem [resolvable:$true] %s60_s23 }
  0x36   :  { %p795_p11 = scmp.lt.u32.totalorder %s791_s26, %s1016_s5 }
  0x38   :  { %p797_p12 = pnand %p795_p11, %p792_p10 }
  0x3a   :  { %800 = shalt.err (!%p797_p12)
}
  0x3b   :  { %s801_s28 = scalar_lea.vmem %s61_s23, 2048  ;;  %p806_p0 = scmp.lt.s32.totalorder %s61_s23, %s61_s23 }
  0x3c   :  { %p802_p13 = scmp.ne.s32.totalorder %s61_s23, %s801_s28  ;;  %p807_p1 = scmp.lt.s32.totalorder %s801_s28, %s801_s28 }
  0x3e   :  { %p808_p2 = por %p807_p1, %p806_p0 }
  0x40   :  { %p809_p3 = pnand %p808_p2, %p802_p13 }
  0x42   :  { %812 = shalt.err (!%p809_p3)
}
  0x43   :  { %66 = dma.hbm_to_vmem [thread:$0]  %s1016_s5, 2048, %s61_s23, [#allocation9], %s844_s15, %s844_s15, %s845_s16  }
  0x44   :  { %835 = dma.done.wait [#allocation3], 128  }
  0x45   :  { %836 = vsyncadd [#allocation3], 4294967168 }
  0x46   :  { %837 = dma.done.wait [#allocation6], 768  }
  0x47   :  { %838 = vsyncadd [#allocation6], 4294966528 }
  0x48   :  { %839 = dma.done.wait [#allocation9], 2048  }
  0x49   :  { %840 = vsyncadd [#allocation9], 4294965248  ;;  %v849_v0 = vmov 0.0|0.0   ;;  %vm850_vm0 = vmmov 0   ;;  %v851_v1 = vmov 0.0   ;;  %v89_v2 = vld [vmem:[#allocation5] sm:$0xff]  ;;  %v357_v47 = vlaneseq }
  0x4a   :  { %677 = vmatprep.subr.bf16.mxu1 %v849_v0  ;;  %630 = vmatprep.mubr.msk.f32.mxu1 %vm850_vm0, %v851_v1  ;;  %v90_v3 = vld [vmem:[#allocation5 + $0x8] sm:$0xff]  ;;  %v170_v5 = vld [vmem:[#allocation7] sm:$0xff]  ;;  %v171_v6 = vld [vmem:[#allocation7 + $0x8] sm:$0xff]  ;;  %vm85_vm1 = vcmask 195584   ;;  %v852_v45 = vmov 0   ;;  %s854_s11 = smov [#allocation10]  }
  0x4b   :  { %683 = vmatprep.subr.bf16.mxu0 %v849_v0  ;;  %674 = vmatprep.mubr.msk.f32.mxu0 %vm850_vm0, %v851_v1  ;;  %v678_v4 = vpack.c.bf16 %v90_v3, %v89_v2  ;;  %v251_v7 = vld [vmem:[#allocation8] sm:$0xff]  ;;  %v252_v8 = vld [vmem:[#allocation8 + $0x8] sm:$0xff]  ;;  %v253_v10 = vld [vmem:[#allocation8 + $0x10] sm:$0xff]  ;;  %v681_v14 = vpack.c.bf16 %v171_v6, %v170_v5  ;;  %v977_v50 = vshrl.u32 %v357_v47, 7  ;;  %v853_v53 = vmov 1966171168  }
  0x4c   :  { %v684_v9 = vpack.c.bf16 %v252_v8, %v251_v7  ;;  %v254_v11 = vld [vmem:[#allocation8 + $0x18] sm:$0xff]  ;;  %v91_v12 = vld [vmem:[#allocation5 + $0x10] sm:$0xff]  ;;  %v83_v13 = vld [vmem:[#allocation2] sm:$0xff]  ;;  %719 = vset.pattern.permute.xlu1 %v852_v45  ;;  %720 = vset.pattern.permute.xlu0 %v852_v45  ;;  %v394_v54 = vunpack.c.l.s4 %v853_v53  ;;  %s582_s12 = sshll.u32 %s854_s11, 4  ;;  %vm574_vm2 = vcmask 57344   ;;  %s583_s12 = int_to_ptr.vmem [resolvable:$true] %s582_s12 }
  0x4d   :  { %679 = vmatpush3.bf16.msra.mxu1 %v678_v4  ;;  %v687_v15 = vpack.c.bf16 %v254_v11, %v253_v10  ;;  %v255_v16 = vld [vmem:[#allocation8 + $0x20] sm:$0xff]  ;;  %v256_v17 = vld [vmem:[#allocation8 + $0x28] sm:$0xff]  ;;  %v172_v18 = vld [vmem:[#allocation7 + $0x10] sm:$0xff]  ;;  %v84_v28 = vmul.f32 %v83_v13, %v83_v13  ;;  %v359_v52 = vsub.s32 0, %v977_v50  ;;  %v363_v55 = vsub.s32 1, %v977_v50  ;;  %s813_s13 = scalar_lea.vmem %s583_s12, 16  ;;  %p818_p5 = scmp.lt.s32.totalorder %s583_s12, %s583_s12 }
  0x4e   :  { %628 = vmatprep.subr.mxu1 %v851_v1  ;;  %685 = vmatpush3.bf16.msra.mxu0 %v684_v9  ;;  %v690_v19 = vpack.c.bf16 %v256_v17, %v255_v16  ;;  %v257_v20 = vld [vmem:[#allocation8 + $0x30] sm:$0xff]  ;;  %v258_v21 = vld [vmem:[#allocation8 + $0x38] sm:$0xff]  ;;  %v259_v23 = vld [vmem:[#allocation8 + $0x40] sm:$0xff]  ;;  %v367_v56 = vsub.s32 2, %v977_v50  ;;  %v371_v57 = vsub.s32 3, %v977_v50  ;;  %v375_v59 = vsub.s32 4, %v977_v50  ;;  %p814_p4 = scmp.ne.s32.totalorder %s583_s12, %s813_s13 }
  0x4f   :  { %686 = vmatprep.subr.bf16.mxu0 %v849_v0  ;;  %v693_v22 = vpack.c.bf16 %v258_v21, %v257_v20  ;;  %v260_v24 = vld [vmem:[#allocation8 + $0x48] sm:$0xff]  ;;  %v261_v26 = vld [vmem:[#allocation8 + $0x50] sm:$0xff]  ;;  %v262_v27 = vld [vmem:[#allocation8 + $0x58] sm:$0xff]  ;;  %v86_v30 = vsel %vm85_vm1, %v84_v28, 0.0  ;;  %v379_v60 = vsub.s32 5, %v977_v50  ;;  %v383_v61 = vsub.s32 6, %v977_v50 }
  0x50   :  { %v696_v25 = vpack.c.bf16 %v260_v24, %v259_v23  ;;  %v699_v29 = vpack.c.bf16 %v262_v27, %v261_v26  ;;  %87 = vadd.xlane.f32.xlu0 %v86_v30  ;;  %v263_v31 = vld [vmem:[#allocation8 + $0x60] sm:$0xff]  ;;  %v264_v32 = vld [vmem:[#allocation8 + $0x68] sm:$0xff]  ;;  %v265_v34 = vld [vmem:[#allocation8 + $0x70] sm:$0xff]  ;;  %v387_v62 = vsub.s32 7, %v977_v50  ;;  %s817_s14 = scalar_lea.vmem %s583_s12, 32 }
  0x51   :  { %629 = vmatpush3.msra.mxu1 %v91_v12  ;;  %v702_v33 = vpack.c.bf16 %v264_v32, %v263_v31  ;;  %v266_v35 = vld [vmem:[#allocation8 + $0x78] sm:$0xff]  ;;  %v594_v40 = vld [vmem:[%s1015_s4] ss:$0 sm:$0xff]  ;;  %p819_p6 = scmp.lt.s32.totalorder %s817_s14, %s813_s13 }
  0x52   :  { %631 = vmatmul.mubr.msk.f32.vlgmr.msra.gmra.mrb[0].mxu1 %vm85_vm1, %v83_v13  ;;  %680 = vmatprep.subr.bf16.mxu1 %v849_v0  ;;  %v705_v36 = vpack.c.bf16 %v266_v35, %v265_v34  ;;  %v596_v58 = vld [vmem:[%s1017_s6] ss:$0 sm:$0xff] }
  0x53   :  { %682 = vmatpush3.bf16.msra.mxu1 %v681_v14  ;;  %639 = vmatprep.mubr.msk.f32.mxu1 %vm850_vm0, %v851_v1  ;;  %v597_v7 = vld [vmem:[%s1018_s7] ss:$0 sm:$0xff]  ;;  %p820_p7 = por %p819_p6, %p818_p5 }
  0x54   :  { %637 = vmatprep.subr.mxu1 %v851_v1  ;;  %688 = vmatpush3.bf16.msra.mxu0 %v687_v15  ;;  %v395_v1 = vunpack.c.0.s8 %v394_v54 }
  0x55   :  { %689 = vmatprep.subr.bf16.mxu0 %v849_v0  ;;  %p821_p8 = pnand %p820_p7, %p814_p4 }
  0x56   :  { %v398_v14 = vsub.s32 %v395_v1, %v977_v50 }
  0x57   :  { %638 = vmatpush3.msra.mxu1 %v172_v18 }
  0x58   :  { %640 = vmatmul.mubr.msk.f32.vlgmr.msra.gmra.mrb[2].mxu1 %vm85_vm1, %v83_v13  ;;  %691 = vmatpush3.bf16.msra.mxu0 %v690_v19 }
  0x59   :  { %692 = vmatprep.subr.bf16.mxu0 %v849_v0 }
  0x5c   :  { %694 = vmatpush3.bf16.msra.mxu0 %v693_v22 }
  0x5d   :  { %695 = vmatprep.subr.bf16.mxu0 %v849_v0 }
  0x60   :  { %697 = vmatpush3.bf16.msra.mxu0 %v696_v25 }
  0x61   :  { %698 = vmatprep.subr.bf16.mxu0 %v849_v0 }
  0x64   :  { %700 = vmatpush3.bf16.msra.mxu0 %v699_v29 }
  0x65   :  { %701 = vmatprep.subr.bf16.mxu0 %v849_v0 }
  0x68   :  { %703 = vmatpush3.bf16.msra.mxu0 %v702_v33 }
  0x69   :  { %704 = vmatprep.subr.bf16.mxu0 %v849_v0 }
  0x6c   :  { %706 = vmatpush3.bf16.msra.mxu0 %v705_v36 }
  0xdd   :  { %v88_v46 = vpop.xlane.xlu0 %87 }
 0x125   :  { %v161_v37 = vpop.f32.mrb[0].mxu1 }
 0x126   :  { %v165_v38 = vmul.f32 %v161_v37, %v161_v37  ;;  %v632_v39 = vpop.f32.mrb[1].mxu1 }
 0x128   :  { %166 = vadd.xlane.f32.xlu0 %v165_v38 }
 0x12b   :  { %v246_v41 = vpop.f32.mrb[2].mxu1 }
 0x12c   :  { %v247_v42 = vadd.f32 %v594_v40, %v246_v41  ;;  %v641_v43 = vpop.f32.mrb[3].mxu1 }
 0x12e   :  { %v250_v44 = vmax.f32 %v247_v42, 0.0 }
 0x130   :  { %675 = vmatmul.mubr.f32.vlgmr.msra.gmra.mrb[0].mxu0 %v250_v44 }
 0x1b5   :  { %v167_v48 = vpop.xlane.xlu0 %166 }
 0x1b6   :  { %v168_v49 = vsub.f32 %v167_v48, %v88_v46 }
 0x1b8   :  { %v169_v51 = vmul.f32 0.5, %v168_v49 }
 0x1ba   :  { %v360_v0 = vrot.slane %v169_v51, %v359_v52  ;;  %v364_v4 = vrot.slane %v169_v51, %v363_v55  ;;  %v368_v5 = vrot.slane %v169_v51, %v367_v56  ;;  %v372_v6 = vrot.slane %v169_v51, %v371_v57 }
 0x1bb   :  { %v376_v8 = vrot.slane %v169_v51, %v375_v59  ;;  %v380_v9 = vrot.slane %v169_v51, %v379_v60  ;;  %v384_v10 = vrot.slane %v169_v51, %v383_v61  ;;  %v388_v11 = vrot.slane %v169_v51, %v387_v62 }
 0x1bc   :  { %v389_v15 = vcombine.low %v360_v0, %v364_v4  ;;  %v390_v16 = vcombine.low %v368_v5, %v372_v6 }
 0x1bd   :  { %v391_v17 = vcombine.low %v376_v8, %v380_v9  ;;  %v392_v18 = vcombine.low %v384_v10, %v388_v11 }
 0x1be   :  { %v399_v19 = vrot.slane %v389_v15, %v398_v14  ;;  %v406_v20 = vrot.slane %v390_v16, %v398_v14 }
 0x1bf   :  { %v413_v21 = vrot.slane %v391_v17, %v398_v14  ;;  %v420_v22 = vrot.slane %v392_v18, %v398_v14 }
 0x1c0   :  { %v421_v23 = vcombine.low %v399_v19, %v406_v20 }
 0x1c1   :  { %v422_v24 = vcombine.low %v413_v21, %v420_v22 }
 0x1c2   :  { %v429_v25 = vrot.slane %v421_v23, %v398_v14 }
 0x1c3   :  { %v436_v26 = vrot.slane %v422_v24, %v398_v14 }
 0x1c5   :  { %v437_v27 = vcombine.low %v429_v25, %v436_v26 }
 0x203   :  { %v340_v63 = vpop.f32.mrb[0].mxu0 }
 0x204   :  { %v341_v2 = vadd.f32 %v596_v58, %v340_v63  ;;  %v676_v3 = vpop.f32.mrb[1].mxu0 }
 0x206   :  { %v344_v12 = vmax.f32 %v341_v2, 0.0 }
 0x208   :  { %v352_v13 = vmul.f32 %v597_v7, %v344_v12 }
 0x20a   :  { %353 = vadd.xlane.f32.xlu1 %v352_v13 }
 0x21b   :  { %439 = vperm.xlu1 %719, %v437_v27  }
 0x297   :  { %v354_v28 = vpop.xlane.xlu1 %353 }
 0x298   :  { %v467_v29 = vrot.slane %v354_v28, %v359_v52  ;;  %v471_v30 = vrot.slane %v354_v28, %v363_v55  ;;  %v475_v31 = vrot.slane %v354_v28, %v367_v56  ;;  %v479_v32 = vrot.slane %v354_v28, %v371_v57 }
 0x299   :  { %v483_v33 = vrot.slane %v354_v28, %v375_v59  ;;  %v487_v34 = vrot.slane %v354_v28, %v379_v60  ;;  %v491_v35 = vrot.slane %v354_v28, %v383_v61  ;;  %v495_v36 = vrot.slane %v354_v28, %v387_v62  ;;  %v355_v60 = vld [vmem:[%s1012_s1] sm:$0x1] }
 0x29a   :  { %v496_v37 = vcombine.low %v467_v29, %v471_v30  ;;  %v497_v38 = vcombine.low %v475_v31, %v479_v32  ;;  %v442_v52 = vand.u32 127, %v357_v47 }
 0x29b   :  { %v498_v39 = vcombine.low %v483_v33, %v487_v34  ;;  %v499_v40 = vcombine.low %v491_v35, %v495_v36  ;;  %v440_v54 = vpop.permute.xlu1 %439 }
 0x29c   :  { %v506_v41 = vrot.slane %v496_v37, %v398_v14  ;;  %v513_v42 = vrot.slane %v497_v38, %v398_v14  ;;  %v445_v53 = vsub.s32 %v442_v52, %v977_v50 }
 0x29d   :  { %v520_v43 = vrot.slane %v498_v39, %v398_v14  ;;  %v527_v44 = vrot.slane %v499_v40, %v398_v14 }
 0x29e   :  { %v528_v45 = vcombine.low %v506_v41, %v513_v42  ;;  %v446_v55 = vrot.slane %v440_v54, %v445_v53 }
 0x29f   :  { %v529_v46 = vcombine.low %v520_v43, %v527_v44 }
 0x2a0   :  { %v536_v48 = vrot.slane %v528_v45, %v398_v14  ;;  %v453_v56 = vrot.slane %v446_v55, %v398_v14 }
 0x2a1   :  { %v543_v49 = vrot.slane %v529_v46, %v398_v14 }
 0x2a2   :  { %v460_v58 = vrot.slane %v453_v56, %v398_v14 }
 0x2a3   :  { %v544_v51 = vcombine.low %v536_v48, %v543_v49 }
 0x2a4   :  { %v462_v62 = vadd.f32 %v460_v58, %v355_v60 }
 0x2a5   :  { %546 = vperm.xlu0 %720, %v544_v51  }
 0x324   :  { %v547_v57 = vpop.permute.xlu0 %546 }
 0x325   :  { %v551_v59 = vrot.slane %v547_v57, %v445_v53 }
 0x327   :  { %v558_v61 = vrot.slane %v551_v59, %v398_v14 }
 0x329   :  { %v565_v63 = vrot.slane %v558_v61, %v398_v14 }
 0x32b   :  { %v567_v0 = vadd.f32 %v565_v63, %v462_v62 }
 0x32d   :  { %v598_v1 = vmul.f32 -1.442695, %v567_v0 }
 0x32f   :  { %721 = vpow2.f32 %v598_v1 }
 0x339   :  { %v722_v2 = vpop.eup %721 }
 0x33a   :  { %v571_v47 = vadd.f32 1.0, %v722_v2 }
 0x33c   :  { %723 = vrcp.f32 %v571_v47 }
 0x346   :  { %v724_v50 = vpop.eup %723 }
 0x347   :  { %575 = vst.msk [vmem:[#allocation10] sm:$0x1] %vm574_vm2, %v724_v50 }
 0x348   :  { %824 = shalt.err (!%p821_p8)
}
 0x349   :  { %s825_s18 = scalar_lea.hbm %s1019_s8, 16 }
 0x34a   :  { %p826_p9 = scmp.ne.s32.totalorder %s1019_s8, %s825_s18  ;;  %p829_p10 = scmp.lt.u32.totalorder %s825_s18, %s1019_s8 }
 0x34c   :  { %p831_p11 = pnand %p829_p10, %p826_p9 }
 0x34e   :  { %834 = shalt.err (!%p831_p11)
}
 0x34f   :  { %585 = dma.vmem_to_hbm [thread:$0]  %s583_s12, 16, %s1019_s8, [#allocation4]  }
 0x350   :  { %841 = dma.done.wait [#allocation4], 16  }
 0x351   :  { %842 = vsyncadd [#allocation4], 4294967280 }
 0x352   :  { %589 = vsyncpa [#allocation3], 1 }
 0x353   :  { %590 = vsyncpa [#allocation6], 1 }
 0x354   :  { %591 = vsyncpa [#allocation9], 1 }
 0x355   :  { %592 = vsyncpa [#allocation4], 1 }

</bundles_post_ra>
